<compile_context>
chip_gen: v6e
topology: v6e:2x2x1
jax: 0.10.0
libtpu: 0.0.40
codegen_flags: <defaults>
</compile_context>

<pallas_src>
import jax
import jax.numpy as jnp
from jax.experimental import pallas as pl
from jax.experimental.pallas import tpu as pltpu


def _round_up(x, m):
    return ((x + m - 1) // m) * m


def _round_down_min(x, m):
    return max(m, (x // m) * m)


def _largest_divisor_leq(n, cap):
    cap = max(1, min(n, cap))
    for d in range(cap, 0, -1):
        if n % d == 0:
            return d
    return 1


def _make_root_kernel(num_inputs, nb):
    """Kernel body specialized on #inputs and samples-per-grid-step (nb)."""

    def kernel(*refs):
        # refs = x_0 .. x_{k-1}, w_0 .. w_{k-1}, bias, out
        x_refs = refs[:num_inputs]
        w_refs = refs[num_inputs:2 * num_inputs]
        bias = refs[2 * num_inputs][...]            # (C_out, 1), f32
        o_ref = refs[2 * num_inputs + 1]            # (NB, C_out, TS)

        for n in range(nb):                          # static unroll over samples
            # 1x1 conv (+ folded BN scale, + folded residual identity) as a
            # channels-on-sublane matmul, accumulated in f32 on the MXU.
            acc = jnp.dot(w_refs[0][...], x_refs[0][n],
                          preferred_element_type=jnp.float32)
            for i in range(1, num_inputs):
                acc = acc + jnp.dot(w_refs[i][...], x_refs[i][n],
                                    preferred_element_type=jnp.float32)
            o_ref[n] = jnp.maximum(acc + bias, 0.0).astype(o_ref.dtype)

    return kernel


def root_forward(inputs, weight, gamma, beta, running_mean, running_var,
                 residual=True, eps=1e-5, tile_s=2048,
                 vmem_budget_bytes=12 * 1024 * 1024,
                 compute_dtype=None, out_dtype=None):
    """inputs: list of NCHW arrays. weight: (C_out, sum(C_i)) 1x1 conv weight."""
    num_inputs = len(inputs)
    N, _, H, W = inputs[0].shape
    c_list = [int(x.shape[1]) for x in inputs]
    c_in = sum(c_list)
    c_out = int(weight.shape[0])
    assert weight.shape[1] == c_in
    if residual:
        assert c_list[0] == c_out, "residual requires inputs[0] channels == c_out"

    in_dtype = inputs[0].dtype
    compute_dtype = compute_dtype or in_dtype
    out_dtype = out_dtype or in_dtype

    HW = H * W

    # --- tile sizing against a conservative cross-generation VMEM budget ----
    in_item = jnp.dtype(compute_dtype).itemsize
    out_item = jnp.dtype(out_dtype).itemsize
    w_bytes = c_out * c_in * in_item + c_out * 4           # single-buffered consts
    per_lane = 2 * (c_in * in_item + c_out * out_item)     # double-buffered act/out
    max_lanes = max(128, (vmem_budget_bytes - w_bytes) // per_lane)

    ts_cap = _round_down_min(min(tile_s, max_lanes), 128)
    if HW <= ts_cap:
        TS = _round_up(HW, 128)      # one lane-aligned tile; tail lanes masked
    else:
        TS = ts_cap
    num_s = pl.cdiv(HW, TS)

    # v7x megacore: try to provide >= 2 parallel grid steps.
    if N == 1 and num_s == 1 and HW > 128:
        TS = _round_up(pl.cdiv(HW, 2), 128)
        num_s = pl.cdiv(HW, TS)

    # Small feature maps, many samples: batch several images per grid step
    # (amortizes per-step overhead) while keeping >= 2 steps for both TCs.
    if num_s == 1 and N > 1:
        nb_cap = max(1, max_lanes // TS)
        NB = _largest_divisor_leq(N, min(nb_cap, pl.cdiv(N, 2)))
    else:
        NB = 1

    # NCHW -> (N, C, H*W) is a free reshape: no transpose, no extra HBM pass.
    xs = []
    for x in inputs:
        x2 = x.reshape(N, x.shape[1], HW)
        if x2.dtype != compute_dtype:
            # TODO(synk): prefer producing inputs already in compute_dtype upstream;
            # a standalone cast here is an extra HBM pass on a mem-bound op.
            x2 = x2.astype(compute_dtype)
        xs.append(x2)

    # Fold BN scale into the 1x1 conv weight; fold the residual as an identity
    # block added to the inputs[0] weight chunk (rides the MXU accumulation).
    scale = (gamma / jnp.sqrt(running_var + eps)).astype(jnp.float32)
    w_folded = weight.astype(jnp.float32) * scale[:, None]            # (C_out, C_in)
    bias = (beta - running_mean * scale).reshape(c_out, 1).astype(jnp.float32)

    w_chunks = []
    off = 0
    for idx, c in enumerate(c_list):
        wc = w_folded[:, off:off + c]
        if residual and idx == 0:
            wc = wc + jnp.eye(c_out, c, dtype=jnp.float32)
        w_chunks.append(wc.astype(compute_dtype))
        off += c

    grid = (N // NB, num_s)
    kernel = _make_root_kernel(num_inputs, NB)
    out_shape = jax.ShapeDtypeStruct((N, c_out, HW), out_dtype)

    def build_call(single_buffer_consts):
        const_kw = dict(pipeline_mode=pl.Buffered(1)) if single_buffer_consts else {}
        in_specs = (
            [pl.BlockSpec((NB, c, TS), lambda b, s: (b, 0, s)) for c in c_list]
            + [pl.BlockSpec((c_out, c), lambda b, s: (0, 0), **const_kw)
               for c in c_list]
            + [pl.BlockSpec((c_out, 1), lambda b, s: (0, 0), **const_kw)]
        )
        out_specs = pl.BlockSpec((NB, c_out, TS), lambda b, s: (b, 0, s))
        return pl.pallas_call(
            kernel,
            out_shape=out_shape,
            grid_spec=pltpu.PrefetchScalarGridSpec(
                num_scalar_prefetch=0,
                grid=grid,
                in_specs=in_specs,
                out_specs=out_specs,
            ),
            compiler_params=pltpu.CompilerParams(
                dimension_semantics=("parallel", "parallel")),
        )

    try:
        out_flat = build_call(True)(*xs, *w_chunks, bias)
    except Exception:
        # Compatibility fallback: if this JAX build rejects pipeline_mode /
        # Buffered(1) on constant-index blocks, use default double-buffering.
        out_flat = build_call(False)(*xs, *w_chunks, bias)

    return out_flat.reshape(N, c_out, H, W)


def _reference(inputs, weight, gamma, beta, mean, var, residual=True, eps=1e-5):
    x = jnp.concatenate(inputs, axis=1)                                   # NCHW
    y = jnp.einsum('nchw,oc->nohw', x, weight)                            # 1x1 conv
    scale = gamma / jnp.sqrt(var + eps)
    y = y * scale[None, :, None, None] + (beta - mean * scale)[None, :, None, None]
    if residual:
        y = y + inputs[0]
    return jnp.maximum(y, 0.0)


if __name__ == "__main__":
    key = jax.random.PRNGKey(0)
    keys = jax.random.split(key, 10)

    N, H, W = 2, 16, 16
    c0, c1 = 4, 4           # two inputs to the root
    c_in = c0 + c1          # 8
    c_out = 4               # residual requires c_out == channels of inputs[0]

    x0 = jax.random.normal(keys[0], (N, c0, H, W), dtype=jnp.float32)
    x1 = jax.random.normal(keys[1], (N, c1, H, W), dtype=jnp.float32)

    weight = jax.random.normal(keys[2], (c_out, c_in), dtype=jnp.float32) * 0.1
    gamma = jax.random.uniform(keys[3], (c_out,), minval=0.5, maxval=1.5)
    beta = jax.random.normal(keys[4], (c_out,)) * 0.1
    running_mean = jax.random.normal(keys[5], (c_out,)) * 0.1
    running_var = jax.random.uniform(keys[6], (c_out,), minval=0.5, maxval=1.5)

    # --- check 1: residual folded into the weight, aligned H*W, grid (2, 1) ---
    out = root_forward([x0, x1], weight, gamma, beta, running_mean,
                       running_var, residual=True)
    out = jax.block_until_ready(out)
    ref = _reference([x0, x1], weight, gamma, beta, running_mean,
                     running_var, residual=True)
    assert out.shape == (N, c_out, H, W)
    assert jnp.allclose(out, ref, atol=1e-5, rtol=1e-5), "mismatch (residual path)"

    # --- check 2: no residual + ragged H*W (masked partial last block, no pad) ---
    H2, W2 = 20, 20                       # HW = 400 -> two 256-lane tiles, tail masked
    x0b = jax.random.normal(keys[7], (1, c0, H2, W2), dtype=jnp.float32)
    x1b = jax.random.normal(keys[8], (1, c1, H2, W2), dtype=jnp.float32)
    out2 = root_forward([x0b, x1b], weight, gamma, beta, running_mean,
                        running_var, residual=False, tile_s=256)
    out2 = jax.block_until_ready(out2)
    ref2 = _reference([x0b, x1b], weight, gamma, beta, running_mean,
                      running_var, residual=False)
    assert out2.shape == (1, c_out, H2, W2)
    assert jnp.allclose(out2, ref2, atol=1e-5, rtol=1e-5), "mismatch (no-residual path)"

    # --- check 3: small feature map, N=4 -> 2 samples batched per grid step ---
    N3 = 4
    x0c = jax.random.normal(keys[9], (N3, c0, H, W), dtype=jnp.float32)
    x1c = jax.random.normal(keys[0], (N3, c1, H, W), dtype=jnp.float32)
    out3 = root_forward([x0c, x1c], weight, gamma, beta, running_mean,
                        running_var, residual=True)
    out3 = jax.block_until_ready(out3)
    ref3 = _reference([x0c, x1c], weight, gamma, beta, running_mean,
                      running_var, residual=True)
    assert out3.shape == (N3, c_out, H, W)
    assert jnp.allclose(out3, ref3, atol=1e-5, rtol=1e-5), "mismatch (batched-step path)"

    print("KERNEL_OK")
</pallas_src>

<mosaic_0001>
module attributes {stable_mosaic.version = 11 : i64} {
  func.func @kernel(%arg0: i32, %arg1: i32, %arg2: memref<1x4x256xf32, #tpu.memory_space<vmem>>, %arg3: memref<1x4x256xf32, #tpu.memory_space<vmem>>, %arg4: memref<4x4xf32, #tpu.memory_space<vmem>>, %arg5: memref<4x4xf32, #tpu.memory_space<vmem>>, %arg6: memref<4x1xf32, #tpu.memory_space<vmem>>, %arg7: memref<1x4x256xf32, #tpu.memory_space<vmem>>) attributes {dimension_semantics = [#tpu.dimension_semantics<parallel>, #tpu.dimension_semantics<parallel>], iteration_bounds = array<i64: 2, 1>, scalar_prefetch = 0 : i64, scratch_operands = 0 : i64, tpu.core_type = #tpu.core_type<tc>, window_params = [{transform_indices = @transform_0, window_bounds = array<i64: 1, 4, 256>}, {transform_indices = @transform_1, window_bounds = array<i64: 1, 4, 256>}, {pipeline_mode = #tpu.pipeline_mode<synchronous>, transform_indices = @transform_2, window_bounds = array<i64: 4, 4>}, {pipeline_mode = #tpu.pipeline_mode<synchronous>, transform_indices = @transform_3, window_bounds = array<i64: 4, 4>}, {pipeline_mode = #tpu.pipeline_mode<synchronous>, transform_indices = @transform_4, window_bounds = array<i64: 4, 1>}, {transform_indices = @transform_5, window_bounds = array<i64: 1, 4, 256>}]} {
    %c0 = arith.constant 0 : index
    %c0_0 = arith.constant 0 : index
    %0 = vector.load %arg6[%c0, %c0_0] : memref<4x1xf32, #tpu.memory_space<vmem>>, vector<4x1xf32>
    %c0_1 = arith.constant 0 : index
    %c0_2 = arith.constant 0 : index
    %1 = vector.load %arg4[%c0_1, %c0_2] : memref<4x4xf32, #tpu.memory_space<vmem>>, vector<4x4xf32>
    %c0_3 = arith.constant 0 : index
    %c0_4 = arith.constant 0 : index
    %c0_5 = arith.constant 0 : index
    %2 = vector.load %arg2[%c0_3, %c0_4, %c0_5] : memref<1x4x256xf32, #tpu.memory_space<vmem>>, vector<1x4x256xf32>
    %3 = vector.shape_cast %2 : vector<1x4x256xf32> to vector<4x256xf32>
    %cst = arith.constant dense<0.000000e+00> : vector<4x256xf32>
    %4 = tpu.matmul %1, %3, %cst {dimension_numbers = #tpu.dot_dimension_numbers<[1], [0], [0], [1], [0, 0, 1, 1], [], []>} : vector<4x4xf32>, vector<4x256xf32>, vector<4x256xf32> -> vector<4x256xf32>
    %c0_6 = arith.constant 0 : index
    %c0_7 = arith.constant 0 : index
    %5 = vector.load %arg5[%c0_6, %c0_7] : memref<4x4xf32, #tpu.memory_space<vmem>>, vector<4x4xf32>
    %c0_8 = arith.constant 0 : index
    %c0_9 = arith.constant 0 : index
    %c0_10 = arith.constant 0 : index
    %6 = vector.load %arg3[%c0_8, %c0_9, %c0_10] : memref<1x4x256xf32, #tpu.memory_space<vmem>>, vector<1x4x256xf32>
    %7 = vector.shape_cast %6 : vector<1x4x256xf32> to vector<4x256xf32>
    %cst_11 = arith.constant dense<0.000000e+00> : vector<4x256xf32>
    %8 = tpu.matmul %5, %7, %cst_11 {dimension_numbers = #tpu.dot_dimension_numbers<[1], [0], [0], [1], [0, 0, 1, 1], [], []>} : vector<4x4xf32>, vector<4x256xf32>, vector<4x256xf32> -> vector<4x256xf32>
    %9 = arith.addf %4, %8 : vector<4x256xf32>
    %10 = vector.broadcast %0 : vector<4x1xf32> to vector<4x256xf32>
    %11 = arith.addf %9, %10 : vector<4x256xf32>
    %cst_12 = arith.constant 0.000000e+00 : f32
    %12 = vector.broadcast %cst_12 : f32 to vector<4x256xf32>
    %13 = arith.maximumf %11, %12 : vector<4x256xf32>
    %c0_13 = arith.constant 0 : index
    %c0_14 = arith.constant 0 : index
    %c0_15 = arith.constant 0 : index
    %14 = vector.load %arg7[%c0_13, %c0_14, %c0_15] : memref<1x4x256xf32, #tpu.memory_space<vmem>>, vector<1x4x256xf32>
    %15 = vector.shape_cast %14 : vector<1x4x256xf32> to vector<4x256xf32>
    %16 = vector.shape_cast %13 : vector<4x256xf32> to vector<1x4x256xf32>
    tpu.vector_store %arg7[%c0_13, %c0_14, %c0_15], %16 {strides = array<i32>} : memref<1x4x256xf32, #tpu.memory_space<vmem>>, vector<1x4x256xf32>,
    return
  }
  func.func @transform_0(%arg0: i32, %arg1: i32) -> (i32, i32, i32) {
    %c0_i32 = arith.constant 0 : i32
    %c0_i32_0 = arith.constant 0 : i32
    return %arg0, %c0_i32, %arg1 : i32, i32, i32
  }
  func.func @transform_1(%arg0: i32, %arg1: i32) -> (i32, i32, i32) {
    %c0_i32 = arith.constant 0 : i32
    %c0_i32_0 = arith.constant 0 : i32
    return %arg0, %c0_i32, %arg1 : i32, i32, i32
  }
  func.func @transform_2(%arg0: i32, %arg1: i32) -> (i32, i32) {
    %c0_i32 = arith.constant 0 : i32
    %c0_i32_0 = arith.constant 0 : i32
    %c0_i32_1 = arith.constant 0 : i32
    return %c0_i32, %c0_i32_0 : i32, i32
  }
  func.func @transform_3(%arg0: i32, %arg1: i32) -> (i32, i32) {
    %c0_i32 = arith.constant 0 : i32
    %c0_i32_0 = arith.constant 0 : i32
    %c0_i32_1 = arith.constant 0 : i32
    return %c0_i32, %c0_i32_0 : i32, i32
  }
  func.func @transform_4(%arg0: i32, %arg1: i32) -> (i32, i32) {
    %c0_i32 = arith.constant 0 : i32
    %c0_i32_0 = arith.constant 0 : i32
    %c0_i32_1 = arith.constant 0 : i32
    return %c0_i32, %c0_i32_0 : i32, i32
  }
  func.func @transform_5(%arg0: i32, %arg1: i32) -> (i32, i32, i32) {
    %c0_i32 = arith.constant 0 : i32
    %c0_i32_0 = arith.constant 0 : i32
    return %arg0, %c0_i32, %arg1 : i32, i32, i32
  }
}

module attributes {stable_mosaic.version = 11 : i64} {
  func.func @kernel(%arg0: i32, %arg1: i32, %arg2: memref<1x4x256xf32, #tpu.memory_space<vmem>>, %arg3: memref<1x4x256xf32, #tpu.memory_space<vmem>>, %arg4: memref<4x4xf32, #tpu.memory_space<vmem>>, %arg5: memref<4x4xf32, #tpu.memory_space<vmem>>, %arg6: memref<4x1xf32, #tpu.memory_space<vmem>>, %arg7: memref<1x4x256xf32, #tpu.memory_space<vmem>>) attributes {dimension_semantics = [#tpu.dimension_semantics<parallel>, #tpu.dimension_semantics<parallel>], iteration_bounds = array<i64: 2, 1>, scalar_prefetch = 0 : i64, scratch_operands = 0 : i64, tpu.core_type = #tpu.core_type<tc>, window_params = [{transform_indices = @transform_0, window_bounds = array<i64: 1, 4, 256>}, {transform_indices = @transform_1, window_bounds = array<i64: 1, 4, 256>}, {pipeline_mode = #tpu.pipeline_mode<synchronous>, transform_indices = @transform_2, window_bounds = array<i64: 4, 4>}, {pipeline_mode = #tpu.pipeline_mode<synchronous>, transform_indices = @transform_3, window_bounds = array<i64: 4, 4>}, {pipeline_mode = #tpu.pipeline_mode<synchronous>, transform_indices = @transform_4, window_bounds = array<i64: 4, 1>}, {transform_indices = @transform_5, window_bounds = array<i64: 1, 4, 256>}]} {
    %c0 = arith.constant 0 : index
    %c0_0 = arith.constant 0 : index
    %0 = vector.load %arg6[%c0, %c0_0] : memref<4x1xf32, #tpu.memory_space<vmem>>, vector<4x1xf32>
    %c0_1 = arith.constant 0 : index
    %c0_2 = arith.constant 0 : index
    %1 = vector.load %arg4[%c0_1, %c0_2] : memref<4x4xf32, #tpu.memory_space<vmem>>, vector<4x4xf32>
    %c0_3 = arith.constant 0 : index
    %c0_4 = arith.constant 0 : index
    %c0_5 = arith.constant 0 : index
    %2 = vector.load %arg2[%c0_3, %c0_4, %c0_5] : memref<1x4x256xf32, #tpu.memory_space<vmem>>, vector<1x4x256xf32>
    %3 = vector.shape_cast %2 : vector<1x4x256xf32> to vector<4x256xf32>
    %cst = arith.constant dense<0.000000e+00> : vector<4x256xf32>
    %4 = tpu.matmul %1, %3, %cst {dimension_numbers = #tpu.dot_dimension_numbers<[1], [0], [0], [1], [0, 0, 1, 1], [], []>} : vector<4x4xf32>, vector<4x256xf32>, vector<4x256xf32> -> vector<4x256xf32>
    %c0_6 = arith.constant 0 : index
    %c0_7 = arith.constant 0 : index
    %5 = vector.load %arg5[%c0_6, %c0_7] : memref<4x4xf32, #tpu.memory_space<vmem>>, vector<4x4xf32>
    %c0_8 = arith.constant 0 : index
    %c0_9 = arith.constant 0 : index
    %c0_10 = arith.constant 0 : index
    %6 = vector.load %arg3[%c0_8, %c0_9, %c0_10] : memref<1x4x256xf32, #tpu.memory_space<vmem>>, vector<1x4x256xf32>
    %7 = vector.shape_cast %6 : vector<1x4x256xf32> to vector<4x256xf32>
    %cst_11 = arith.constant dense<0.000000e+00> : vector<4x256xf32>
    %8 = tpu.matmul %5, %7, %cst_11 {dimension_numbers = #tpu.dot_dimension_numbers<[1], [0], [0], [1], [0, 0, 1, 1], [], []>} : vector<4x4xf32>, vector<4x256xf32>, vector<4x256xf32> -> vector<4x256xf32>
    %9 = arith.addf %4, %8 : vector<4x256xf32>
    %10 = vector.broadcast %0 : vector<4x1xf32> to vector<4x256xf32>
    %11 = arith.addf %9, %10 : vector<4x256xf32>
    %cst_12 = arith.constant 0.000000e+00 : f32
    %12 = vector.broadcast %cst_12 : f32 to vector<4x256xf32>
    %13 = arith.maximumf %11, %12 : vector<4x256xf32>
    %c0_13 = arith.constant 0 : index
    %c0_14 = arith.constant 0 : index
    %c0_15 = arith.constant 0 : index
    %14 = vector.load %arg7[%c0_13, %c0_14, %c0_15] : memref<1x4x256xf32, #tpu.memory_space<vmem>>, vector<1x4x256xf32>
    %15 = vector.shape_cast %14 : vector<1x4x256xf32> to vector<4x256xf32>
    %16 = vector.shape_cast %13 : vector<4x256xf32> to vector<1x4x256xf32>
    tpu.vector_store %arg7[%c0_13, %c0_14, %c0_15], %16 {strides = array<i32>} : memref<1x4x256xf32, #tpu.memory_space<vmem>>, vector<1x4x256xf32>,
    return
  }
  func.func @transform_0(%arg0: i32, %arg1: i32) -> (i32, i32, i32) {
    %c0_i32 = arith.constant 0 : i32
    %c0_i32_0 = arith.constant 0 : i32
    return %arg0, %c0_i32, %arg1 : i32, i32, i32
  }
  func.func @transform_1(%arg0: i32, %arg1: i32) -> (i32, i32, i32) {
    %c0_i32 = arith.constant 0 : i32
    %c0_i32_0 = arith.constant 0 : i32
    return %arg0, %c0_i32, %arg1 : i32, i32, i32
  }
  func.func @transform_2(%arg0: i32, %arg1: i32) -> (i32, i32) {
    %c0_i32 = arith.constant 0 : i32
    %c0_i32_0 = arith.constant 0 : i32
    %c0_i32_1 = arith.constant 0 : i32
    return %c0_i32, %c0_i32_0 : i32, i32
  }
  func.func @transform_3(%arg0: i32, %arg1: i32) -> (i32, i32) {
    %c0_i32 = arith.constant 0 : i32
    %c0_i32_0 = arith.constant 0 : i32
    %c0_i32_1 = arith.constant 0 : i32
    return %c0_i32, %c0_i32_0 : i32, i32
  }
  func.func @transform_4(%arg0: i32, %arg1: i32) -> (i32, i32) {
    %c0_i32 = arith.constant 0 : i32
    %c0_i32_0 = arith.constant 0 : i32
    %c0_i32_1 = arith.constant 0 : i32
    return %c0_i32, %c0_i32_0 : i32, i32
  }
  func.func @transform_5(%arg0: i32, %arg1: i32) -> (i32, i32, i32) {
    %c0_i32 = arith.constant 0 : i32
    %c0_i32_0 = arith.constant 0 : i32
    return %arg0, %c0_i32, %arg1 : i32, i32, i32
  }
}

</mosaic_0001>

<bundles_post_ra>
// kernel: tpu_custom_call.1
= control target key start
LH: loop header
LB: loop body
LE: loop exit
PB: predicated region body
PF: predicated region fallthrough
CT: control target
= control target key end

     0   :  { %s1064_s0 = inlined_call_operand.hbm [shape: f32[2,4,256], index: 0, kind: input, shape index: {}]   ;;  %s1065_s1 = inlined_call_operand.hbm [shape: f32[2,4,256], index: 1, kind: input, shape index: {}]   ;;  %s1066_s2 = inlined_call_operand.vmem [shape: f32[4,4], index: 2, kind: input, shape index: {}]   ;;  %s1067_s3 = inlined_call_operand.vmem [shape: f32[4,4], index: 3, kind: input, shape index: {}]   ;;  %s1068_s4 = inlined_call_operand.vmem [shape: f32[4,1], index: 4, kind: input, shape index: {}]   ;;  %s1069_s5 = inlined_call_operand.hbm [shape: f32[2,4,256], index: 5, kind: output, shape index: {}]  }
   0x1   :  { %1070 = sst [smem:[#allocation11_spill]] %s1064_s0 }
   0x2   :  { %10 = vsyncpa [#allocation3], 0 }
   0x3   :  { %12 = vsyncpa [#allocation3 + $0x1], 0 }
   0x4   :  { %13 = vsyncpa [#allocation6], 0 }
   0x5   :  { %15 = vsyncpa [#allocation6 + $0x1], 0 }
   0x6   :  { %16 = vsyncpa [#allocation4], 0 }
   0x7   :  { %18 = vsyncpa [#allocation4 + $0x1], 0  ;;  %s889_s18 = smov 0   ;;  %s891_s19 = smov 0  }
   0x8   :  { %s893_s20 = smov 0   ;;  %s895_s21 = smov 0  }
   0x9   :  { %s897_s22 = smov 0   ;;  %s899_s23 = smov 0  }
   0xa LB: > { %s612_s24 = sadd.s32 4294967295, %s852_s23   ;;  %s613_s25 = sadd.s32 4294967294, %s852_s23   ;;  %s852_s23 = sphi %s899_s23, %s24_s23   ;;  %s848_s22 = sphi %s897_s22, %s1083_s22   ;;  %s844_s21 = sphi %s895_s21, %s1082_s21   ;;  %s840_s20 = sphi %s893_s20, %s1081_s20   ;;  %s836_s19 = sphi %s891_s19, %s1080_s19   ;;  %s832_s18 = sphi %s889_s18, %s1079_s18  }
   0xb   : > { %s36_s26 = sadd.s32 1, %s848_s22  ;;  %s45_s27 = sadd.s32 1, %s840_s20 }
   0xc   : > { %p38_p0 = scmp.ge.s32.totalorder %s36_s26, 2  ;;  %p52_p1 = scmp.ne.s32.totalorder %s840_s20, %s836_s19 }
   0xd   : > { %p53_p2 = scmp.eq.s32.totalorder %s852_s23, 0  ;;  %p58_p3 = scmp.ne.s32.totalorder %s836_s19, %s832_s18 }
   0xe   : > { %s1085_s26 = smov (%p38_p0, %s36_s26), 0  ;;  %p59_p5 = scmp.eq.s32.totalorder %s612_s24, 0 }
   0xf   : > { %p930_p4 = por %p53_p2, %p52_p1  ;;  %s40_s29 = ssub.s32 %s848_s22, %s1085_s26 }
  0x10   : > { %p175_p6 = scmp.eq.s32.totalorder %s612_s24, 1  ;;  %p43_p7 = scmp.eq.s32.totalorder %s40_s29, 0 }
  0x11   : > { %p936_p8 = por %p59_p5, %p58_p3  ;;  %p181_p10 = scmp.eq.s32.totalorder %s613_s25, 1 }
  0x12   : > { %p940_p9 = por %p175_p6, %p52_p1  ;;  %p657_p13 = scmp.lt.s32.totalorder %s852_s23, 2 }
  0x13   : > { %s945_s7 = scalar_select %p43_p7, %s840_s20, %s45_s27  }
  0x14   : > { %p947_p11 = por %p181_p10, %p58_p3  ;;  %s954_s9 = sand.u32 1, %s840_s20  }
  0x15   : > { %s616_s10 = sshll.u32 %s954_s9, 3  ;;  %s637_s11 = sshll.u32 %s848_s22, 7 }
  0x16   : > { %s1075_s0 = sld [smem:[#allocation11_spill]]  ;;  %s214_s15 = scalar_lea.vmem [#allocation2], %s616_s10 }
  0x17   : > { %s224_s16 = sshll.u32 %s214_s15, 4  ;;  %p963_p0 = pnand %p657_p13, %p930_p4  ;;  %s225_s16 = int_to_ptr.vmem [resolvable:$true] %s224_s16 }
  0x18   : > { %p622_p1 = scmp.ge.s32.totalorder %s852_s23, 1  ;;  %p250_p2 = scmp.lt.s32.totalorder %s852_s23, 3 }
  0x19   : > { %s211_s24 = scalar_lea.sflag [#allocation3], %s954_s9  ;;  %p714_p3 = pneg %p963_p0 }
  0x1a   : > { %s725_s25 = scalar_lea.vmem %s225_s16, 128  ;;  %s854_s27 = smov [#allocation2]  }
  0x1b   : > { %p726_p5 = scmp.ne.s32.totalorder %s225_s16, %s725_s25  ;;  %s730_s29 = sshll.u32 %s854_s27, 4  ;;  %s731_s29 = int_to_ptr.vmem [resolvable:$false] %s730_s29 }
  0x1c   : > { %s222_s14 = scalar_lea.hbm %s1075_s0, %s637_s11  ;;  %s732_s28 = scalar_lea.vmem %s731_s29, 256 }
  0x1d   : > { %p728_p6 = pnand %p726_p5, %p714_p3  ;;  %p733_p4 = scmp.lt.s32.totalorder %s225_s16, %s731_s29 }
  0x1e   : > { %p734_p10 = scmp.lt.s32.totalorder %s732_s28, %s725_s25 }
  0x1f   : > { %p729_p7 = pneg %p728_p6 }
  0x20   : > { %p735_p13 = por %p734_p10, %p733_p4 }
  0x22   : > { %p736_p12 = pnand %p735_p13, %p729_p7 }
  0x24   : > { %739 = shalt.err (!%p736_p12)
}
  0x25   : > { %649 = dma.hbm_to_vmem [thread:$0]  (!%p963_p0), %s222_s14, 128, %s225_s16, %s211_s24  }
  0x26   : > { %p981_p5 = pnand %p622_p1, %p250_p2  ;;  %s243_s25 = scalar_lea.hbm %s1065_s1, %s637_s11 }
  0x27   : > { %s235_s27 = scalar_lea.vmem [#allocation5], %s616_s10  ;;  %s232_s28 = scalar_lea.sflag [#allocation6], %s954_s9 }
  0x28   : > { %s245_s29 = sshll.u32 %s235_s27, 4  ;;  %s855_s14 = smov [#allocation5]   ;;  %s246_s29 = int_to_ptr.vmem [resolvable:$true] %s245_s29 }
  0x29   : > { %s753_s0 = scalar_lea.vmem %s246_s29, 128  ;;  %s758_s16 = sshll.u32 %s855_s14, 4  ;;  %s759_s16 = int_to_ptr.vmem [resolvable:$false] %s758_s16 }
  0x2a   : > { %p754_p12 = scmp.ne.s32.totalorder %s246_s29, %s753_s0  ;;  %s760_s24 = scalar_lea.vmem %s759_s16, 256 }
  0x2b   : > { %p761_p1 = scmp.lt.s32.totalorder %s246_s29, %s759_s16  ;;  %p762_p2 = scmp.lt.s32.totalorder %s760_s24, %s753_s0 }
  0x2c   : > { %p756_p6 = pnand %p754_p12, %p714_p3 }
  0x2d   : > { %p763_p4 = por %p762_p2, %p761_p1 }
  0x2e   : > { %p757_p7 = pneg %p756_p6 }
  0x30   : > { %p764_p10 = pnand %p763_p4, %p757_p7 }
  0x32   : > { %767 = shalt.err (!%p764_p10)
}
  0x33   : > { %652 = dma.hbm_to_vmem [thread:$0]  (!%p963_p0), %s243_s25, 128, %s246_s29, %s232_s28  }
  0x34   : > { %254 = sbr.rel (%p981_p5) target bundleno = 282 (0x11a), region = 40  ;;  %s997_s9 = sand.u32 (!%p981_p5), 1, %s836_s19  }
  0x35   : > { %s1000_s10 = sshll.u32 (!%p981_p5), %s997_s9, 3  ;;  %s257_s11 = scalar_lea.sflag (!%p981_p5), [#allocation3], %s997_s9 }
  0x36   : > { %s260_s0 = scalar_lea.vmem (!%p981_p5), [#allocation2], %s1000_s10 }
  0x39   : > { %819 = dma.done.wait (%p936_p8), %s257_s11, 128  }
  0x3a   : > { %821 = vsyncadd (%p936_p8), %s257_s11, 4294967168  ;;  %s266_s17 = scalar_lea.sflag [#allocation6], %s997_s9  ;;  %s269_s12 = scalar_lea.vmem [#allocation5], %s1000_s10 }
  0x3b   : > { %823 = dma.done.wait (%p936_p8), %s266_s17, 128  }
  0x3c   : > { %825 = vsyncadd (%p936_p8), %s266_s17, 4294967168  ;;  %v856_v0 = vmov 0.0   ;;  %v857_v1 = vmov 0   ;;  %v308_v2 = vld [vmem:[%s269_s12] sm:$0xff]  ;;  %vm315_vm0 = vcmask 1043456   ;;  %v306_v3 = vld [vmem:[%s260_s0] sm:$0xff] }
  0x3d   : > { %384 = vmatprep.mubr.f32.mxu0 %v856_v0  ;;  %464 = vmatprep.mubr.f32.mxu1 %v856_v0  ;;  %v310_v4 = vcombine.high %v308_v2, %v308_v2  ;;  %v392_v5 = vcombine.high %v306_v3, %v306_v3  ;;  %v304_v6 = vld [vmem:[%s1068_s4] sm:$0xf]  ;;  %vm311_vm1 = vcmask 31744   ;;  %s639_s28 = sshll.u32 %s844_s21, 7  ;;  %s300_s14 = scalar_lea.vmem [#allocation7], %s1000_s10 }
  0x3e   : > { %709 = vset.pattern.permute.xlu0 %v857_v1  ;;  %v307_v7 = vld [vmem:[%s1067_s3] sm:$0xf]  ;;  %s502_s16 = sshll.u32 %s300_s14, 4  ;;  %s500_s0 = scalar_lea.hbm %s1069_s5, %s639_s28  ;;  %s503_s16 = int_to_ptr.vmem [resolvable:$true] %s502_s16 }
  0x3f   : > { %v305_v8 = vld [vmem:[%s1066_s2] sm:$0xf]  ;;  %473 = vperm.xlu0 %709, %v304_v6   ;;  %626 = vmatprep.subr.msk.mxu0 %vm315_vm0, %v310_v4  ;;  %s486_s17 = scalar_lea.sflag [#allocation4], %s997_s9  ;;  %s768_s12 = scalar_lea.vmem %s503_s16, 128 }
  0x40   : > { %629 = vmatprep.subr.msk.mxu1 %vm315_vm0, %v392_v5  ;;  %627 = vmatpush1.msk.msra.mxu0 %vm315_vm0, %v308_v2  ;;  %p769_p8 = scmp.ne.s32.totalorder %s503_s16, %s768_s12  ;;  %s858_s13 = smov [#allocation7]  }
  0x41   : > { %630 = vmatpush1.msk.msra.mxu1 %vm315_vm0, %v306_v3  ;;  %628 = vmatmul.mubr.msk.f32.vlgmr.msra.gmra.mxu0 %vm311_vm1, %v307_v7  ;;  %s772_s15 = sshll.u32 %s858_s13, 4  ;;  %s773_s15 = int_to_ptr.vmem [resolvable:$false] %s772_s15 }
  0x42   : > { %631 = vmatmul.mubr.msk.f32.vlgmr.msra.gmra.mxu1 %vm311_vm1, %v305_v8  ;;  %p770_p0 = pnand %p769_p8, %p940_p9  ;;  %s774_s21 = scalar_lea.vmem %s773_s15, 256 }
  0x43   : > { %p775_p13 = scmp.lt.s32.totalorder %s503_s16, %s773_s15  ;;  %p776_p5 = scmp.lt.s32.totalorder %s774_s21, %s768_s12 }
  0x44   : > { %p771_p3 = pneg %p770_p0 }
  0x45   : > { %p777_p12 = por %p776_p5, %p775_p13 }
  0x47   : > { %p778_p6 = pnand %p777_p12, %p771_p3 }
  0xba   : > { %v474_v9 = vpop.permute.xlu0 %473 }
 0x101   : > { %v386_v10 = vpop.f32.mrf.mxu0 }
 0x102   : > { %v466_v11 = vpop.f32.mrf.mxu1 }
 0x103   : > { %v467_v12 = vadd.f32 %v466_v11, %v386_v10  ;;  %v388_v13 = vpop.f32.mrf.mxu0 }
 0x104   : > { %v468_v14 = vpop.f32.mrf.mxu1 }
 0x105   : > { %v469_v15 = vadd.f32 %v468_v14, %v388_v13  ;;  %v476_v16 = vadd.f32 %v474_v9, %v467_v12 }
 0x107   : > { %v477_v17 = vadd.f32 %v474_v9, %v469_v15  ;;  %v478_v18 = vmax.f32 %v476_v16, 0.0 }
 0x109   : > { %v479_v19 = vmax.f32 %v477_v17, 0.0 }
 0x10b   : > { %v482_v20 = vcombine.low %v478_v18, %v479_v19 }
 0x10d   : > { %484 = vst [vmem:[%s300_s14] sm:$0xff] %v482_v20 }
 0x10e   : > { %781 = shalt.err (!%p778_p6)
}
 0x10f   : > { %s782_s10 = scalar_lea.hbm %s500_s0, 128  ;;  %s786_s27 = scalar_lea.hbm %s1069_s5, 256 }
 0x110   : > { %p783_p7 = scmp.ne.s32.totalorder %s500_s0, %s782_s10  ;;  %p787_p4 = scmp.lt.s32.totalorder %s500_s0, %s1069_s5 }
 0x111   : > { %p788_p10 = scmp.lt.s32.totalorder %s786_s27, %s782_s10 }
 0x112   : > { %p784_p1 = pnand %p783_p7, %p940_p9 }
 0x113   : > { %p789_p8 = por %p788_p10, %p787_p4 }
 0x114   : > { %p785_p2 = pneg %p784_p1 }
 0x116   : > { %p790_p0 = pnand %p789_p8, %p785_p2 }
 0x118   : > { %793 = shalt.err (!%p790_p0)
}
 0x119   : > { %644 = dma.vmem_to_hbm [thread:$0]  (%p940_p9), %s503_s16, 128, %s500_s0, %s486_s17  }
 0x11a PF: > { %s514_s28 = sand.u32 1, %s832_s18   ;;  %p1078_p3 = scmp.ge.s32.totalorder %s852_s23, 2 }
 0x11b   : > { %s515_s14 = scalar_lea.sflag [#allocation4], %s514_s28 }
 0x11c   : > { %p654_p13 = pnand %p1078_p3, %p947_p11 }
 0x11e   : > { %p655_p5 = pneg %p654_p13 }
 0x120   : > { %827 = dma.done.wait (%p655_p5), %s515_s14, 128  }
 0x121   : > { %829 = vsyncadd (%p655_p5), %s515_s14, 4294967168  ;;  %s24_s23 = sadd.s32 1, %s852_s23   ;;  %s1079_s18 = smov %s836_s19 }
 0x122   : > { %p21_p12 = scmp.ge.s32.totalorder %s24_s23, 4   ;;  %s1080_s19 = smov %s840_s20 }
 0x123   : > { %s1081_s20 = smov %s945_s7  ;;  %s1082_s21 = smov %s848_s22 }
 0x124   : > { %s1083_s22 = smov %s1085_s26  ;;  %23 = sbr.rel (!%p21_p12) target bundleno = 10 (0xa), region = 98 }
 0x129   :  { %520 = vsyncpa [#allocation3], 1 }
 0x12a   :  { %522 = vsyncpa [#allocation3 + $0x1], 1 }
 0x12b   :  { %523 = vsyncpa [#allocation6], 1 }
 0x12c   :  { %525 = vsyncpa [#allocation6 + $0x1], 1 }
 0x12d   :  { %526 = vsyncpa [#allocation4], 1 }
 0x12e   :  { %528 = vsyncpa [#allocation4 + $0x1], 1 }

// kernel: tpu_custom_call.1
= control target key start
LH: loop header
LB: loop body
LE: loop exit
PB: predicated region body
PF: predicated region fallthrough
CT: control target
= control target key end

     0   :  { %s1064_s0 = inlined_call_operand.hbm [shape: f32[2,4,256], index: 0, kind: input, shape index: {}]   ;;  %s1065_s1 = inlined_call_operand.hbm [shape: f32[2,4,256], index: 1, kind: input, shape index: {}]   ;;  %s1066_s2 = inlined_call_operand.vmem [shape: f32[4,4], index: 2, kind: input, shape index: {}]   ;;  %s1067_s3 = inlined_call_operand.vmem [shape: f32[4,4], index: 3, kind: input, shape index: {}]   ;;  %s1068_s4 = inlined_call_operand.vmem [shape: f32[4,1], index: 4, kind: input, shape index: {}]   ;;  %s1069_s5 = inlined_call_operand.hbm [shape: f32[2,4,256], index: 5, kind: output, shape index: {}]  }
   0x1   :  { %1070 = sst [smem:[#allocation11_spill]] %s1064_s0 }
   0x2   :  { %10 = vsyncpa [#allocation3], 0 }
   0x3   :  { %12 = vsyncpa [#allocation3 + $0x1], 0 }
   0x4   :  { %13 = vsyncpa [#allocation6], 0 }
   0x5   :  { %15 = vsyncpa [#allocation6 + $0x1], 0 }
   0x6   :  { %16 = vsyncpa [#allocation4], 0 }
   0x7   :  { %18 = vsyncpa [#allocation4 + $0x1], 0  ;;  %s889_s18 = smov 0   ;;  %s891_s19 = smov 0  }
   0x8   :  { %s893_s20 = smov 0   ;;  %s895_s21 = smov 0  }
   0x9   :  { %s897_s22 = smov 0   ;;  %s899_s23 = smov 0  }
   0xa LB: > { %s612_s24 = sadd.s32 4294967295, %s852_s23   ;;  %s613_s25 = sadd.s32 4294967294, %s852_s23   ;;  %s852_s23 = sphi %s899_s23, %s24_s23   ;;  %s848_s22 = sphi %s897_s22, %s1083_s22   ;;  %s844_s21 = sphi %s895_s21, %s1082_s21   ;;  %s840_s20 = sphi %s893_s20, %s1081_s20   ;;  %s836_s19 = sphi %s891_s19, %s1080_s19   ;;  %s832_s18 = sphi %s889_s18, %s1079_s18  }
   0xb   : > { %s36_s26 = sadd.s32 1, %s848_s22  ;;  %s45_s27 = sadd.s32 1, %s840_s20 }
   0xc   : > { %p38_p0 = scmp.ge.s32.totalorder %s36_s26, 2  ;;  %p52_p1 = scmp.ne.s32.totalorder %s840_s20, %s836_s19 }
   0xd   : > { %p53_p2 = scmp.eq.s32.totalorder %s852_s23, 0  ;;  %p58_p3 = scmp.ne.s32.totalorder %s836_s19, %s832_s18 }
   0xe   : > { %s1085_s26 = smov (%p38_p0, %s36_s26), 0  ;;  %p59_p5 = scmp.eq.s32.totalorder %s612_s24, 0 }
   0xf   : > { %p930_p4 = por %p53_p2, %p52_p1  ;;  %s40_s29 = ssub.s32 %s848_s22, %s1085_s26 }
  0x10   : > { %p175_p6 = scmp.eq.s32.totalorder %s612_s24, 1  ;;  %p43_p7 = scmp.eq.s32.totalorder %s40_s29, 0 }
  0x11   : > { %p936_p8 = por %p59_p5, %p58_p3  ;;  %p181_p10 = scmp.eq.s32.totalorder %s613_s25, 1 }
  0x12   : > { %p940_p9 = por %p175_p6, %p52_p1  ;;  %p657_p13 = scmp.lt.s32.totalorder %s852_s23, 2 }
  0x13   : > { %s945_s7 = scalar_select %p43_p7, %s840_s20, %s45_s27  }
  0x14   : > { %p947_p11 = por %p181_p10, %p58_p3  ;;  %s954_s9 = sand.u32 1, %s840_s20  }
  0x15   : > { %s616_s10 = sshll.u32 %s954_s9, 3  ;;  %s637_s11 = sshll.u32 %s848_s22, 7 }
  0x16   : > { %s1075_s0 = sld [smem:[#allocation11_spill]]  ;;  %s214_s15 = scalar_lea.vmem [#allocation2], %s616_s10 }
  0x17   : > { %s224_s16 = sshll.u32 %s214_s15, 4  ;;  %p963_p0 = pnand %p657_p13, %p930_p4  ;;  %s225_s16 = int_to_ptr.vmem [resolvable:$true] %s224_s16 }
  0x18   : > { %p622_p1 = scmp.ge.s32.totalorder %s852_s23, 1  ;;  %p250_p2 = scmp.lt.s32.totalorder %s852_s23, 3 }
  0x19   : > { %s211_s24 = scalar_lea.sflag [#allocation3], %s954_s9  ;;  %p714_p3 = pneg %p963_p0 }
  0x1a   : > { %s725_s25 = scalar_lea.vmem %s225_s16, 128  ;;  %s854_s27 = smov [#allocation2]  }
  0x1b   : > { %p726_p5 = scmp.ne.s32.totalorder %s225_s16, %s725_s25  ;;  %s730_s29 = sshll.u32 %s854_s27, 4  ;;  %s731_s29 = int_to_ptr.vmem [resolvable:$false] %s730_s29 }
  0x1c   : > { %s222_s14 = scalar_lea.hbm %s1075_s0, %s637_s11  ;;  %s732_s28 = scalar_lea.vmem %s731_s29, 256 }
  0x1d   : > { %p728_p6 = pnand %p726_p5, %p714_p3  ;;  %p733_p4 = scmp.lt.s32.totalorder %s225_s16, %s731_s29 }
  0x1e   : > { %p734_p10 = scmp.lt.s32.totalorder %s732_s28, %s725_s25 }
  0x1f   : > { %p729_p7 = pneg %p728_p6 }
  0x20   : > { %p735_p13 = por %p734_p10, %p733_p4 }
  0x22   : > { %p736_p12 = pnand %p735_p13, %p729_p7 }
  0x24   : > { %739 = shalt.err (!%p736_p12)
}
  0x25   : > { %649 = dma.hbm_to_vmem [thread:$0]  (!%p963_p0), %s222_s14, 128, %s225_s16, %s211_s24  }
  0x26   : > { %p981_p5 = pnand %p622_p1, %p250_p2  ;;  %s243_s25 = scalar_lea.hbm %s1065_s1, %s637_s11 }
  0x27   : > { %s235_s27 = scalar_lea.vmem [#allocation5], %s616_s10  ;;  %s232_s28 = scalar_lea.sflag [#allocation6], %s954_s9 }
  0x28   : > { %s245_s29 = sshll.u32 %s235_s27, 4  ;;  %s855_s14 = smov [#allocation5]   ;;  %s246_s29 = int_to_ptr.vmem [resolvable:$true] %s245_s29 }
  0x29   : > { %s753_s0 = scalar_lea.vmem %s246_s29, 128  ;;  %s758_s16 = sshll.u32 %s855_s14, 4  ;;  %s759_s16 = int_to_ptr.vmem [resolvable:$false] %s758_s16 }
  0x2a   : > { %p754_p12 = scmp.ne.s32.totalorder %s246_s29, %s753_s0  ;;  %s760_s24 = scalar_lea.vmem %s759_s16, 256 }
  0x2b   : > { %p761_p1 = scmp.lt.s32.totalorder %s246_s29, %s759_s16  ;;  %p762_p2 = scmp.lt.s32.totalorder %s760_s24, %s753_s0 }
  0x2c   : > { %p756_p6 = pnand %p754_p12, %p714_p3 }
  0x2d   : > { %p763_p4 = por %p762_p2, %p761_p1 }
  0x2e   : > { %p757_p7 = pneg %p756_p6 }
  0x30   : > { %p764_p10 = pnand %p763_p4, %p757_p7 }
  0x32   : > { %767 = shalt.err (!%p764_p10)
}
  0x33   : > { %652 = dma.hbm_to_vmem [thread:$0]  (!%p963_p0), %s243_s25, 128, %s246_s29, %s232_s28  }
  0x34   : > { %254 = sbr.rel (%p981_p5) target bundleno = 282 (0x11a), region = 40  ;;  %s997_s9 = sand.u32 (!%p981_p5), 1, %s836_s19  }
  0x35   : > { %s1000_s10 = sshll.u32 (!%p981_p5), %s997_s9, 3  ;;  %s257_s11 = scalar_lea.sflag (!%p981_p5), [#allocation3], %s997_s9 }
  0x36   : > { %s260_s0 = scalar_lea.vmem (!%p981_p5), [#allocation2], %s1000_s10 }
  0x39   : > { %819 = dma.done.wait (%p936_p8), %s257_s11, 128  }
  0x3a   : > { %821 = vsyncadd (%p936_p8), %s257_s11, 4294967168  ;;  %s266_s17 = scalar_lea.sflag [#allocation6], %s997_s9  ;;  %s269_s12 = scalar_lea.vmem [#allocation5], %s1000_s10 }
  0x3b   : > { %823 = dma.done.wait (%p936_p8), %s266_s17, 128  }
  0x3c   : > { %825 = vsyncadd (%p936_p8), %s266_s17, 4294967168  ;;  %v856_v0 = vmov 0.0   ;;  %v857_v1 = vmov 0   ;;  %v308_v2 = vld [vmem:[%s269_s12] sm:$0xff]  ;;  %vm315_vm0 = vcmask 1043456   ;;  %v306_v3 = vld [vmem:[%s260_s0] sm:$0xff] }
  0x3d   : > { %384 = vmatprep.mubr.f32.mxu0 %v856_v0  ;;  %464 = vmatprep.mubr.f32.mxu1 %v856_v0  ;;  %v310_v4 = vcombine.high %v308_v2, %v308_v2  ;;  %v392_v5 = vcombine.high %v306_v3, %v306_v3  ;;  %v304_v6 = vld [vmem:[%s1068_s4] sm:$0xf]  ;;  %vm311_vm1 = vcmask 31744   ;;  %s639_s28 = sshll.u32 %s844_s21, 7  ;;  %s300_s14 = scalar_lea.vmem [#allocation7], %s1000_s10 }
  0x3e   : > { %709 = vset.pattern.permute.xlu0 %v857_v1  ;;  %v307_v7 = vld [vmem:[%s1067_s3] sm:$0xf]  ;;  %s502_s16 = sshll.u32 %s300_s14, 4  ;;  %s500_s0 = scalar_lea.hbm %s1069_s5, %s639_s28  ;;  %s503_s16 = int_to_ptr.vmem [resolvable:$true] %s502_s16 }
  0x3f   : > { %v305_v8 = vld [vmem:[%s1066_s2] sm:$0xf]  ;;  %473 = vperm.xlu0 %709, %v304_v6   ;;  %626 = vmatprep.subr.msk.mxu0 %vm315_vm0, %v310_v4  ;;  %s486_s17 = scalar_lea.sflag [#allocation4], %s997_s9  ;;  %s768_s12 = scalar_lea.vmem %s503_s16, 128 }
  0x40   : > { %629 = vmatprep.subr.msk.mxu1 %vm315_vm0, %v392_v5  ;;  %627 = vmatpush1.msk.msra.mxu0 %vm315_vm0, %v308_v2  ;;  %p769_p8 = scmp.ne.s32.totalorder %s503_s16, %s768_s12  ;;  %s858_s13 = smov [#allocation7]  }
  0x41   : > { %630 = vmatpush1.msk.msra.mxu1 %vm315_vm0, %v306_v3  ;;  %628 = vmatmul.mubr.msk.f32.vlgmr.msra.gmra.mxu0 %vm311_vm1, %v307_v7  ;;  %s772_s15 = sshll.u32 %s858_s13, 4  ;;  %s773_s15 = int_to_ptr.vmem [resolvable:$false] %s772_s15 }
  0x42   : > { %631 = vmatmul.mubr.msk.f32.vlgmr.msra.gmra.mxu1 %vm311_vm1, %v305_v8  ;;  %p770_p0 = pnand %p769_p8, %p940_p9  ;;  %s774_s21 = scalar_lea.vmem %s773_s15, 256 }
  0x43   : > { %p775_p13 = scmp.lt.s32.totalorder %s503_s16, %s773_s15  ;;  %p776_p5 = scmp.lt.s32.totalorder %s774_s21, %s768_s12 }
  0x44   : > { %p771_p3 = pneg %p770_p0 }
  0x45   : > { %p777_p12 = por %p776_p5, %p775_p13 }
  0x47   : > { %p778_p6 = pnand %p777_p12, %p771_p3 }
  0xba   : > { %v474_v9 = vpop.permute.xlu0 %473 }
 0x101   : > { %v386_v10 = vpop.f32.mrf.mxu0 }
 0x102   : > { %v466_v11 = vpop.f32.mrf.mxu1 }
 0x103   : > { %v467_v12 = vadd.f32 %v466_v11, %v386_v10  ;;  %v388_v13 = vpop.f32.mrf.mxu0 }
 0x104   : > { %v468_v14 = vpop.f32.mrf.mxu1 }
 0x105   : > { %v469_v15 = vadd.f32 %v468_v14, %v388_v13  ;;  %v476_v16 = vadd.f32 %v474_v9, %v467_v12 }
 0x107   : > { %v477_v17 = vadd.f32 %v474_v9, %v469_v15  ;;  %v478_v18 = vmax.f32 %v476_v16, 0.0 }
 0x109   : > { %v479_v19 = vmax.f32 %v477_v17, 0.0 }
 0x10b   : > { %v482_v20 = vcombine.low %v478_v18, %v479_v19 }
 0x10d   : > { %484 = vst [vmem:[%s300_s14] sm:$0xff] %v482_v20 }
 0x10e   : > { %781 = shalt.err (!%p778_p6)
}
 0x10f   : > { %s782_s10 = scalar_lea.hbm %s500_s0, 128  ;;  %s786_s27 = scalar_lea.hbm %s1069_s5, 256 }
 0x110   : > { %p783_p7 = scmp.ne.s32.totalorder %s500_s0, %s782_s10  ;;  %p787_p4 = scmp.lt.s32.totalorder %s500_s0, %s1069_s5 }
 0x111   : > { %p788_p10 = scmp.lt.s32.totalorder %s786_s27, %s782_s10 }
 0x112   : > { %p784_p1 = pnand %p783_p7, %p940_p9 }
 0x113   : > { %p789_p8 = por %p788_p10, %p787_p4 }
 0x114   : > { %p785_p2 = pneg %p784_p1 }
 0x116   : > { %p790_p0 = pnand %p789_p8, %p785_p2 }
 0x118   : > { %793 = shalt.err (!%p790_p0)
}
 0x119   : > { %644 = dma.vmem_to_hbm [thread:$0]  (%p940_p9), %s503_s16, 128, %s500_s0, %s486_s17  }
 0x11a PF: > { %s514_s28 = sand.u32 1, %s832_s18   ;;  %p1078_p3 = scmp.ge.s32.totalorder %s852_s23, 2 }
 0x11b   : > { %s515_s14 = scalar_lea.sflag [#allocation4], %s514_s28 }
 0x11c   : > { %p654_p13 = pnand %p1078_p3, %p947_p11 }
 0x11e   : > { %p655_p5 = pneg %p654_p13 }
 0x120   : > { %827 = dma.done.wait (%p655_p5), %s515_s14, 128  }
 0x121   : > { %829 = vsyncadd (%p655_p5), %s515_s14, 4294967168  ;;  %s24_s23 = sadd.s32 1, %s852_s23   ;;  %s1079_s18 = smov %s836_s19 }
 0x122   : > { %p21_p12 = scmp.ge.s32.totalorder %s24_s23, 4   ;;  %s1080_s19 = smov %s840_s20 }
 0x123   : > { %s1081_s20 = smov %s945_s7  ;;  %s1082_s21 = smov %s848_s22 }
 0x124   : > { %s1083_s22 = smov %s1085_s26  ;;  %23 = sbr.rel (!%p21_p12) target bundleno = 10 (0xa), region = 98 }
 0x129   :  { %520 = vsyncpa [#allocation3], 1 }
 0x12a   :  { %522 = vsyncpa [#allocation3 + $0x1], 1 }
 0x12b   :  { %523 = vsyncpa [#allocation6], 1 }
 0x12c   :  { %525 = vsyncpa [#allocation6 + $0x1], 1 }
 0x12d   :  { %526 = vsyncpa [#allocation4], 1 }
 0x12e   :  { %528 = vsyncpa [#allocation4 + $0x1], 1 }

</bundles_post_ra>
